<compile_context>
chip_gen: v5e
topology: v5e:2x2
jax: 0.10.0
libtpu: 0.0.40
codegen_flags: <defaults>
</compile_context>

<pallas_src>
import functools

import jax
import jax.numpy as jnp
from jax.experimental import pallas as pl
from jax.experimental.pallas import tpu as pltpu


def _spatial_op_kernel(x_ref, wdw_ref, bdw_ref, wpw_ref, masks_ref, out_ref, *, W):
    """One block = TB images in NC(HW) layout (lane axis = H*W, lane-dense).

    x_ref     : (TB, C, HW)  input images (I/O dtype), spatial dims flattened
    wdw_ref   : (9, C, 1)    depthwise 3x3 weights (BN scale folded), tap-major (kh*3+kw)
    bdw_ref   : (1, C, 1)    folded bias: (conv_bias - bn_mean)*scale + bn_beta
    wpw_ref   : (1, C, 1)    1x1 conv (C -> 1) weights
    masks_ref : (4, 1, HW)   0/1 validity: [w>0, w<W-1, h>0, h<H-1]
    out_ref   : (TB, C, HW)
    """
    TB, C, HW = x_ref.shape

    x = x_ref[...].astype(jnp.float32)                       # compute in f32

    # Neighbour-validity masks (bool, (1, HW)); exact-zero padding via select.
    vl = masks_ref[0] != 0.0
    vr = masks_ref[1] != 0.0
    vt = masks_ref[2] != 0.0
    vb = masks_ref[3] != 0.0

    # Column-shifted, pre-masked copies of x.  pltpu.roll == jnp.roll semantics:
    # roll(x, s)[p] = x[p - s], so shift +1 fetches the (h, w-1) neighbour.
    # Rolls land on the XLU slot (idle here); masks kill the intra-row wrap.
    xl = jnp.where(vl, pltpu.roll(x, 1, 2), 0.0)              # value at (h, w-1)
    xr = jnp.where(vr, pltpu.roll(x, HW - 1, 2), 0.0)         # value at (h, w+1)

    # Depthwise 3x3 conv: weight each column variant at the *source* row, then
    # shift whole rows by +-W lanes (the per-channel weights and the column masks
    # depend only on the w coordinate / channel, so they commute with the W-shift).
    s_top = wdw_ref[0] * xl + wdw_ref[1] * x + wdw_ref[2] * xr   # row h-1 contrib
    s_mid = wdw_ref[3] * xl + wdw_ref[4] * x + wdw_ref[5] * xr   # row h   contrib
    s_bot = wdw_ref[6] * xl + wdw_ref[7] * x + wdw_ref[8] * xr   # row h+1 contrib

    acc = (s_mid
           + jnp.where(vt, pltpu.roll(s_top, W, 2), 0.0)
           + jnp.where(vb, pltpu.roll(s_bot, HW - W, 2), 0.0))

    # Folded BatchNorm bias + ReLU.
    acc = jnp.maximum(acc + bdw_ref[...], 0.0)

    # 1x1 conv (C -> 1, no bias): cross-sublane reduction -> lane-dense (TB,1,HW),
    # then Sigmoid (EUP).
    attn = jnp.sum(acc * wpw_ref[...], axis=1, keepdims=True)
    attn = jax.nn.sigmoid(attn)

    # Re-read x late (don't keep it live across the stencil) and modulate.
    out_ref[...] = (x_ref[...].astype(jnp.float32) * attn).astype(out_ref.dtype)


def _pick_batch_tile(B, per_image_bytes, target_bytes=2 << 20, min_blocks=2):
    """Largest TB dividing B with block ~target_bytes, but keep >= min_blocks blocks."""
    tb = int(max(1, min(B, target_bytes // max(per_image_bytes, 1))))
    tb = min(tb, max(1, B // min_blocks))      # >= 2 blocks when B >= 2 (megacore / pipelining)
    while B % tb != 0:
        tb -= 1
    return tb


def spatial_operation(x_nchw, w_dw, b_dw, bn_gamma, bn_beta, bn_mean, bn_var, w_pw,
                      eps=1e-5):
    """x_nchw: (B, C, H, W). Returns (B, C, H, W) = x * sigmoid(block(x)).

    I/O dtype follows x (pass bf16 to halve HBM traffic); math is f32 in-kernel.
    """
    B, C, H, W = x_nchw.shape
    HW = H * W
    io_dtype = x_nchw.dtype

    # Fold BatchNorm (eval mode) into the depthwise conv.
    scale = bn_gamma / jnp.sqrt(bn_var + eps)                                  # (C,)
    wdw_folded = (w_dw * scale[None, None, :]).reshape(9, C)[:, :, None]       # (9, C, 1)
    wdw_folded = wdw_folded.astype(jnp.float32)
    bdw_folded = ((b_dw - bn_mean) * scale + bn_beta)[None, :, None]           # (1, C, 1)
    bdw_folded = bdw_folded.astype(jnp.float32)
    wpw = w_pw[None, :, None].astype(jnp.float32)                              # (1, C, 1)

    # Flatten spatial dims (contiguous -> metadata-only reshape); keep NCHW order.
    x_flat = x_nchw.reshape(B, C, HW)

    # Tiny 0/1 validity masks (DMA'd once, resident): left / right / top / bottom.
    w_idx = jnp.arange(HW, dtype=jnp.int32) % W
    h_idx = jnp.arange(HW, dtype=jnp.int32) // W
    masks = jnp.stack([
        w_idx > 0,
        w_idx < W - 1,
        h_idx > 0,
        h_idx < H - 1,
    ]).astype(jnp.float32)[:, None, :]                                         # (4, 1, HW)

    TB = _pick_batch_tile(B, C * HW * x_flat.dtype.itemsize)
    grid = (B // TB,)

    kernel = functools.partial(_spatial_op_kernel, W=W)

    out_flat = pl.pallas_call(
        kernel,
        out_shape=jax.ShapeDtypeStruct((B, C, HW), io_dtype),
        grid_spec=pltpu.PrefetchScalarGridSpec(
            num_scalar_prefetch=0,
            grid=grid,
            in_specs=[
                pl.BlockSpec((TB, C, HW), lambda b: (b, 0, 0)),
                pl.BlockSpec((9, C, 1), lambda b: (0, 0, 0)),
                pl.BlockSpec((1, C, 1), lambda b: (0, 0, 0)),
                pl.BlockSpec((1, C, 1), lambda b: (0, 0, 0)),
                pl.BlockSpec((4, 1, HW), lambda b: (0, 0, 0)),
            ],
            out_specs=pl.BlockSpec((TB, C, HW), lambda b: (b, 0, 0)),
        ),
        compiler_params=pltpu.CompilerParams(
            dimension_semantics=("parallel",),
            vmem_limit_bytes=32 * 1024 * 1024,
        ),
    )(x_flat, wdw_folded, bdw_folded, wpw, masks)

    # Un-flatten the spatial dims (free reshape) -> NCHW, matching PyTorch.
    return out_flat.reshape(B, C, H, W)


def _reference(x, w_dw, b_dw, bn_gamma, bn_beta, bn_mean, bn_var, w_pw, eps=1e-5):
    """Pure-JAX NCHW reference (un-folded BN) for a correctness check."""
    B, C, H, W = x.shape
    x = x.astype(jnp.float32)
    xp = jnp.pad(x, ((0, 0), (0, 0), (1, 1), (1, 1)))
    acc = jnp.zeros((B, C, H, W), jnp.float32)
    for dh in range(3):
        for dw in range(3):
            acc = acc + xp[:, :, dh:dh + H, dw:dw + W] * w_dw[dh, dw, :][None, :, None, None]
    acc = acc + b_dw[None, :, None, None]
    acc = ((acc - bn_mean[None, :, None, None])
           / jnp.sqrt(bn_var + eps)[None, :, None, None]
           * bn_gamma[None, :, None, None]
           + bn_beta[None, :, None, None])
    acc = jnp.maximum(acc, 0.0)
    attn = jax.nn.sigmoid(jnp.sum(acc * w_pw[None, :, None, None], axis=1, keepdims=True))
    return x * attn


if __name__ == "__main__":
    B, C, H, W = 2, 4, 16, 16

    key = jax.random.PRNGKey(0)
    kx, kw1, kb1, kw2, kg, kbt = jax.random.split(key, 6)

    x = jax.random.normal(kx, (B, C, H, W), jnp.float32)

    # Deterministic synthetic parameters (shapes implied by the PyTorch __init__).
    w_dw = 0.1 * jax.random.normal(kw1, (3, 3, C), jnp.float32)   # depthwise 3x3, groups=C
    b_dw = 0.05 * jax.random.normal(kb1, (C,), jnp.float32)       # depthwise conv bias
    bn_gamma = 1.0 + 0.1 * jax.random.normal(kg, (C,), jnp.float32)
    bn_beta = 0.1 * jax.random.normal(kbt, (C,), jnp.float32)
    bn_mean = jnp.zeros((C,), jnp.float32)
    bn_var = jnp.ones((C,), jnp.float32)
    w_pw = 0.2 * jax.random.normal(kw2, (C,), jnp.float32)        # 1x1 conv C->1, no bias

    # f32 I/O path (matches PyTorch default semantics).
    out = spatial_operation(x, w_dw, b_dw, bn_gamma, bn_beta, bn_mean, bn_var, w_pw)
    out = jax.block_until_ready(out)
    ref = _reference(x, w_dw, b_dw, bn_gamma, bn_beta, bn_mean, bn_var, w_pw)
    assert out.shape == (B, C, H, W)
    assert jnp.allclose(out, ref, atol=1e-4, rtol=1e-4)

    # bf16-streaming path (half the HBM bytes; in-kernel math stays f32).
    x_bf16 = x.astype(jnp.bfloat16)
    out_bf16 = spatial_operation(x_bf16, w_dw, b_dw, bn_gamma, bn_beta, bn_mean, bn_var, w_pw)
    out_bf16 = jax.block_until_ready(out_bf16)
    ref_bf16 = _reference(x_bf16.astype(jnp.float32), w_dw, b_dw,
                          bn_gamma, bn_beta, bn_mean, bn_var, w_pw)
    assert out_bf16.dtype == jnp.bfloat16
    assert jnp.allclose(out_bf16.astype(jnp.float32), ref_bf16, atol=5e-2, rtol=5e-2)

    print("KERNEL_OK")
</pallas_src>

<mosaic_0001>
module attributes {stable_mosaic.version = 11 : i64} {
  func.func @_spatial_op_kernel(%arg0: i32, %arg1: memref<1x4x256xf32, #tpu.memory_space<vmem>>, %arg2: memref<9x4x1xf32, #tpu.memory_space<vmem>>, %arg3: memref<1x4x1xf32, #tpu.memory_space<vmem>>, %arg4: memref<1x4x1xf32, #tpu.memory_space<vmem>>, %arg5: memref<4x1x256xf32, #tpu.memory_space<vmem>>, %arg6: memref<1x4x256xf32, #tpu.memory_space<vmem>>) attributes {dimension_semantics = [#tpu.dimension_semantics<parallel>], iteration_bounds = array<i64: 2>, scalar_prefetch = 0 : i64, scratch_operands = 0 : i64, tpu.core_type = #tpu.core_type<tc>, window_params = [{transform_indices = @transform_0, window_bounds = array<i64: 1, 4, 256>}, {pipeline_mode = #tpu.pipeline_mode<synchronous>, transform_indices = @transform_1, window_bounds = array<i64: 9, 4, 1>}, {pipeline_mode = #tpu.pipeline_mode<synchronous>, transform_indices = @transform_2, window_bounds = array<i64: 1, 4, 1>}, {pipeline_mode = #tpu.pipeline_mode<synchronous>, transform_indices = @transform_3, window_bounds = array<i64: 1, 4, 1>}, {pipeline_mode = #tpu.pipeline_mode<synchronous>, transform_indices = @transform_4, window_bounds = array<i64: 4, 1, 256>}, {transform_indices = @transform_5, window_bounds = array<i64: 1, 4, 256>}]} {
    %c0 = arith.constant 0 : index
    %c0_0 = arith.constant 0 : index
    %c0_1 = arith.constant 0 : index
    %0 = vector.load %arg1[%c0, %c0_0, %c0_1] : memref<1x4x256xf32, #tpu.memory_space<vmem>>, vector<1x4x256xf32>
    %c0_2 = arith.constant 0 : index
    %c0_3 = arith.constant 0 : index
    %c0_4 = arith.constant 0 : index
    %1 = vector.load %arg5[%c0_2, %c0_3, %c0_4] : memref<4x1x256xf32, #tpu.memory_space<vmem>>, vector<1x1x256xf32>
    %2 = vector.shape_cast %1 : vector<1x1x256xf32> to vector<1x256xf32>
    %cst = arith.constant 0.000000e+00 : f32
    %3 = vector.broadcast %cst : f32 to vector<1x256xf32>
    %4 = arith.cmpf one, %2, %3 : vector<1x256xf32>
    %c1 = arith.constant 1 : index
    %c0_5 = arith.constant 0 : index
    %c0_6 = arith.constant 0 : index
    %5 = vector.load %arg5[%c1, %c0_5, %c0_6] : memref<4x1x256xf32, #tpu.memory_space<vmem>>, vector<1x1x256xf32>
    %6 = vector.shape_cast %5 : vector<1x1x256xf32> to vector<1x256xf32>
    %cst_7 = arith.constant 0.000000e+00 : f32
    %7 = vector.broadcast %cst_7 : f32 to vector<1x256xf32>
    %8 = arith.cmpf one, %6, %7 : vector<1x256xf32>
    %c2 = arith.constant 2 : index
    %c0_8 = arith.constant 0 : index
    %c0_9 = arith.constant 0 : index
    %9 = vector.load %arg5[%c2, %c0_8, %c0_9] : memref<4x1x256xf32, #tpu.memory_space<vmem>>, vector<1x1x256xf32>
    %10 = vector.shape_cast %9 : vector<1x1x256xf32> to vector<1x256xf32>
    %cst_10 = arith.constant 0.000000e+00 : f32
    %11 = vector.broadcast %cst_10 : f32 to vector<1x256xf32>
    %12 = arith.cmpf one, %10, %11 : vector<1x256xf32>
    %c3 = arith.constant 3 : index
    %c0_11 = arith.constant 0 : index
    %c0_12 = arith.constant 0 : index
    %13 = vector.load %arg5[%c3, %c0_11, %c0_12] : memref<4x1x256xf32, #tpu.memory_space<vmem>>, vector<1x1x256xf32>
    %14 = vector.shape_cast %13 : vector<1x1x256xf32> to vector<1x256xf32>
    %cst_13 = arith.constant 0.000000e+00 : f32
    %15 = vector.broadcast %cst_13 : f32 to vector<1x256xf32>
    %16 = arith.cmpf one, %14, %15 : vector<1x256xf32>
    %c1_i32 = arith.constant 1 : i32
    %17 = tpu.dynamic_rotate %0 by %c1_i32 dim 2 : vector<1x4x256xf32>, i32 -> vector<1x4x256xf32>
    %cst_14 = arith.constant 0.000000e+00 : f32
    %18 = vector.shape_cast %4 : vector<1x256xi1> to vector<1x1x256xi1>
    %19 = vector.broadcast %18 : vector<1x1x256xi1> to vector<1x4x256xi1>
    %20 = vector.broadcast %cst_14 : f32 to vector<1x4x256xf32>
    %21 = arith.select %19, %17, %20 : vector<1x4x256xi1>, vector<1x4x256xf32>
    %c255_i32 = arith.constant 255 : i32
    %22 = tpu.dynamic_rotate %0 by %c255_i32 dim 2 : vector<1x4x256xf32>, i32 -> vector<1x4x256xf32>
    %cst_15 = arith.constant 0.000000e+00 : f32
    %23 = vector.shape_cast %8 : vector<1x256xi1> to vector<1x1x256xi1>
    %24 = vector.broadcast %23 : vector<1x1x256xi1> to vector<1x4x256xi1>
    %25 = vector.broadcast %cst_15 : f32 to vector<1x4x256xf32>
    %26 = arith.select %24, %22, %25 : vector<1x4x256xi1>, vector<1x4x256xf32>
    %c0_16 = arith.constant 0 : index
    %c0_17 = arith.constant 0 : index
    %c0_18 = arith.constant 0 : index
    %27 = vector.load %arg2[%c0_16, %c0_17, %c0_18] : memref<9x4x1xf32, #tpu.memory_space<vmem>>, vector<1x4x1xf32>
    %28 = vector.shape_cast %27 : vector<1x4x1xf32> to vector<4x1xf32>
    %29 = vector.shape_cast %28 : vector<4x1xf32> to vector<1x4x1xf32>
    %30 = vector.broadcast %29 : vector<1x4x1xf32> to vector<1x4x256xf32>
    %31 = arith.mulf %30, %21 : vector<1x4x256xf32>
    %c1_19 = arith.constant 1 : index
    %c0_20 = arith.constant 0 : index
    %c0_21 = arith.constant 0 : index
    %32 = vector.load %arg2[%c1_19, %c0_20, %c0_21] : memref<9x4x1xf32, #tpu.memory_space<vmem>>, vector<1x4x1xf32>
    %33 = vector.shape_cast %32 : vector<1x4x1xf32> to vector<4x1xf32>
    %34 = vector.shape_cast %33 : vector<4x1xf32> to vector<1x4x1xf32>
    %35 = vector.broadcast %34 : vector<1x4x1xf32> to vector<1x4x256xf32>
    %36 = arith.mulf %35, %0 : vector<1x4x256xf32>
    %37 = arith.addf %31, %36 : vector<1x4x256xf32>
    %c2_22 = arith.constant 2 : index
    %c0_23 = arith.constant 0 : index
    %c0_24 = arith.constant 0 : index
    %38 = vector.load %arg2[%c2_22, %c0_23, %c0_24] : memref<9x4x1xf32, #tpu.memory_space<vmem>>, vector<1x4x1xf32>
    %39 = vector.shape_cast %38 : vector<1x4x1xf32> to vector<4x1xf32>
    %40 = vector.shape_cast %39 : vector<4x1xf32> to vector<1x4x1xf32>
    %41 = vector.broadcast %40 : vector<1x4x1xf32> to vector<1x4x256xf32>
    %42 = arith.mulf %41, %26 : vector<1x4x256xf32>
    %43 = arith.addf %37, %42 : vector<1x4x256xf32>
    %c3_25 = arith.constant 3 : index
    %c0_26 = arith.constant 0 : index
    %c0_27 = arith.constant 0 : index
    %44 = vector.load %arg2[%c3_25, %c0_26, %c0_27] : memref<9x4x1xf32, #tpu.memory_space<vmem>>, vector<1x4x1xf32>
    %45 = vector.shape_cast %44 : vector<1x4x1xf32> to vector<4x1xf32>
    %46 = vector.shape_cast %45 : vector<4x1xf32> to vector<1x4x1xf32>
    %47 = vector.broadcast %46 : vector<1x4x1xf32> to vector<1x4x256xf32>
    %48 = arith.mulf %47, %21 : vector<1x4x256xf32>
    %c4 = arith.constant 4 : index
    %c0_28 = arith.constant 0 : index
    %c0_29 = arith.constant 0 : index
    %49 = vector.load %arg2[%c4, %c0_28, %c0_29] : memref<9x4x1xf32, #tpu.memory_space<vmem>>, vector<1x4x1xf32>
    %50 = vector.shape_cast %49 : vector<1x4x1xf32> to vector<4x1xf32>
    %51 = vector.shape_cast %50 : vector<4x1xf32> to vector<1x4x1xf32>
    %52 = vector.broadcast %51 : vector<1x4x1xf32> to vector<1x4x256xf32>
    %53 = arith.mulf %52, %0 : vector<1x4x256xf32>
    %54 = arith.addf %48, %53 : vector<1x4x256xf32>
    %c5 = arith.constant 5 : index
    %c0_30 = arith.constant 0 : index
    %c0_31 = arith.constant 0 : index
    %55 = vector.load %arg2[%c5, %c0_30, %c0_31] : memref<9x4x1xf32, #tpu.memory_space<vmem>>, vector<1x4x1xf32>
    %56 = vector.shape_cast %55 : vector<1x4x1xf32> to vector<4x1xf32>
    %57 = vector.shape_cast %56 : vector<4x1xf32> to vector<1x4x1xf32>
    %58 = vector.broadcast %57 : vector<1x4x1xf32> to vector<1x4x256xf32>
    %59 = arith.mulf %58, %26 : vector<1x4x256xf32>
    %60 = arith.addf %54, %59 : vector<1x4x256xf32>
    %c6 = arith.constant 6 : index
    %c0_32 = arith.constant 0 : index
    %c0_33 = arith.constant 0 : index
    %61 = vector.load %arg2[%c6, %c0_32, %c0_33] : memref<9x4x1xf32, #tpu.memory_space<vmem>>, vector<1x4x1xf32>
    %62 = vector.shape_cast %61 : vector<1x4x1xf32> to vector<4x1xf32>
    %63 = vector.shape_cast %62 : vector<4x1xf32> to vector<1x4x1xf32>
    %64 = vector.broadcast %63 : vector<1x4x1xf32> to vector<1x4x256xf32>
    %65 = arith.mulf %64, %21 : vector<1x4x256xf32>
    %c7 = arith.constant 7 : index
    %c0_34 = arith.constant 0 : index
    %c0_35 = arith.constant 0 : index
    %66 = vector.load %arg2[%c7, %c0_34, %c0_35] : memref<9x4x1xf32, #tpu.memory_space<vmem>>, vector<1x4x1xf32>
    %67 = vector.shape_cast %66 : vector<1x4x1xf32> to vector<4x1xf32>
    %68 = vector.shape_cast %67 : vector<4x1xf32> to vector<1x4x1xf32>
    %69 = vector.broadcast %68 : vector<1x4x1xf32> to vector<1x4x256xf32>
    %70 = arith.mulf %69, %0 : vector<1x4x256xf32>
    %71 = arith.addf %65, %70 : vector<1x4x256xf32>
    %c8 = arith.constant 8 : index
    %c0_36 = arith.constant 0 : index
    %c0_37 = arith.constant 0 : index
    %72 = vector.load %arg2[%c8, %c0_36, %c0_37] : memref<9x4x1xf32, #tpu.memory_space<vmem>>, vector<1x4x1xf32>
    %73 = vector.shape_cast %72 : vector<1x4x1xf32> to vector<4x1xf32>
    %74 = vector.shape_cast %73 : vector<4x1xf32> to vector<1x4x1xf32>
    %75 = vector.broadcast %74 : vector<1x4x1xf32> to vector<1x4x256xf32>
    %76 = arith.mulf %75, %26 : vector<1x4x256xf32>
    %77 = arith.addf %71, %76 : vector<1x4x256xf32>
    %c16_i32 = arith.constant 16 : i32
    %78 = tpu.dynamic_rotate %43 by %c16_i32 dim 2 : vector<1x4x256xf32>, i32 -> vector<1x4x256xf32>
    %cst_38 = arith.constant 0.000000e+00 : f32
    %79 = vector.shape_cast %12 : vector<1x256xi1> to vector<1x1x256xi1>
    %80 = vector.broadcast %79 : vector<1x1x256xi1> to vector<1x4x256xi1>
    %81 = vector.broadcast %cst_38 : f32 to vector<1x4x256xf32>
    %82 = arith.select %80, %78, %81 : vector<1x4x256xi1>, vector<1x4x256xf32>
    %83 = arith.addf %60, %82 : vector<1x4x256xf32>
    %c240_i32 = arith.constant 240 : i32
    %84 = tpu.dynamic_rotate %77 by %c240_i32 dim 2 : vector<1x4x256xf32>, i32 -> vector<1x4x256xf32>
    %cst_39 = arith.constant 0.000000e+00 : f32
    %85 = vector.shape_cast %16 : vector<1x256xi1> to vector<1x1x256xi1>
    %86 = vector.broadcast %85 : vector<1x1x256xi1> to vector<1x4x256xi1>
    %87 = vector.broadcast %cst_39 : f32 to vector<1x4x256xf32>
    %88 = arith.select %86, %84, %87 : vector<1x4x256xi1>, vector<1x4x256xf32>
    %89 = arith.addf %83, %88 : vector<1x4x256xf32>
    %c0_40 = arith.constant 0 : index
    %c0_41 = arith.constant 0 : index
    %c0_42 = arith.constant 0 : index
    %90 = vector.load %arg3[%c0_40, %c0_41, %c0_42] : memref<1x4x1xf32, #tpu.memory_space<vmem>>, vector<1x4x1xf32>
    %91 = vector.broadcast %90 : vector<1x4x1xf32> to vector<1x4x256xf32>
    %92 = arith.addf %89, %91 : vector<1x4x256xf32>
    %cst_43 = arith.constant 0.000000e+00 : f32
    %93 = vector.broadcast %cst_43 : f32 to vector<1x4x256xf32>
    %94 = arith.maximumf %92, %93 : vector<1x4x256xf32>
    %c0_44 = arith.constant 0 : index
    %c0_45 = arith.constant 0 : index
    %c0_46 = arith.constant 0 : index
    %95 = vector.load %arg4[%c0_44, %c0_45, %c0_46] : memref<1x4x1xf32, #tpu.memory_space<vmem>>, vector<1x4x1xf32>
    %96 = vector.broadcast %95 : vector<1x4x1xf32> to vector<1x4x256xf32>
    %97 = arith.mulf %94, %96 : vector<1x4x256xf32>
    %cst_47 = arith.constant dense<0.000000e+00> : vector<1x256xf32>
    %98 = vector.multi_reduction <add>, %97, %cst_47 [1] : vector<1x4x256xf32> to vector<1x256xf32>
    %99 = vector.shape_cast %98 : vector<1x256xf32> to vector<1x1x256xf32>
    %100 = arith.negf %99 : vector<1x1x256xf32>
    %101 = math.exp %100 : vector<1x1x256xf32>
    %cst_48 = arith.constant 1.000000e+00 : f32
    %102 = vector.broadcast %cst_48 : f32 to vector<1x1x256xf32>
    %103 = arith.addf %102, %101 : vector<1x1x256xf32>
    %104 = arith.divf %102, %103 : vector<1x1x256xf32>
    %c0_49 = arith.constant 0 : index
    %c0_50 = arith.constant 0 : index
    %c0_51 = arith.constant 0 : index
    %105 = vector.load %arg1[%c0_49, %c0_50, %c0_51] : memref<1x4x256xf32, #tpu.memory_space<vmem>>, vector<1x4x256xf32>
    %106 = vector.broadcast %104 : vector<1x1x256xf32> to vector<1x4x256xf32>
    %107 = arith.mulf %105, %106 : vector<1x4x256xf32>
    %c0_52 = arith.constant 0 : index
    %c0_53 = arith.constant 0 : index
    %c0_54 = arith.constant 0 : index
    %108 = vector.load %arg6[%c0_52, %c0_53, %c0_54] : memref<1x4x256xf32, #tpu.memory_space<vmem>>, vector<1x4x256xf32>
    tpu.vector_store %arg6[%c0_52, %c0_53, %c0_54], %107 {strides = array<i32>} : memref<1x4x256xf32, #tpu.memory_space<vmem>>, vector<1x4x256xf32>,
    return
  }
  func.func @transform_0(%arg0: i32) -> (i32, i32, i32) {
    %c0_i32 = arith.constant 0 : i32
    %c0_i32_0 = arith.constant 0 : i32
    %c0_i32_1 = arith.constant 0 : i32
    return %arg0, %c0_i32, %c0_i32_0 : i32, i32, i32
  }
  func.func @transform_1(%arg0: i32) -> (i32, i32, i32) {
    %c0_i32 = arith.constant 0 : i32
    %c0_i32_0 = arith.constant 0 : i32
    %c0_i32_1 = arith.constant 0 : i32
    %c0_i32_2 = arith.constant 0 : i32
    return %c0_i32, %c0_i32_0, %c0_i32_1 : i32, i32, i32
  }
  func.func @transform_2(%arg0: i32) -> (i32, i32, i32) {
    %c0_i32 = arith.constant 0 : i32
    %c0_i32_0 = arith.constant 0 : i32
    %c0_i32_1 = arith.constant 0 : i32
    %c0_i32_2 = arith.constant 0 : i32
    return %c0_i32, %c0_i32_0, %c0_i32_1 : i32, i32, i32
  }
  func.func @transform_3(%arg0: i32) -> (i32, i32, i32) {
    %c0_i32 = arith.constant 0 : i32
    %c0_i32_0 = arith.constant 0 : i32
    %c0_i32_1 = arith.constant 0 : i32
    %c0_i32_2 = arith.constant 0 : i32
    return %c0_i32, %c0_i32_0, %c0_i32_1 : i32, i32, i32
  }
  func.func @transform_4(%arg0: i32) -> (i32, i32, i32) {
    %c0_i32 = arith.constant 0 : i32
    %c0_i32_0 = arith.constant 0 : i32
    %c0_i32_1 = arith.constant 0 : i32
    %c0_i32_2 = arith.constant 0 : i32
    return %c0_i32, %c0_i32_0, %c0_i32_1 : i32, i32, i32
  }
  func.func @transform_5(%arg0: i32) -> (i32, i32, i32) {
    %c0_i32 = arith.constant 0 : i32
    %c0_i32_0 = arith.constant 0 : i32
    %c0_i32_1 = arith.constant 0 : i32
    return %arg0, %c0_i32, %c0_i32_0 : i32, i32, i32
  }
}

</mosaic_0001>

<bundles_post_ra>
// kernel: tpu_custom_call.1
= control target key start
LH: loop header
LB: loop body
LE: loop exit
PB: predicated region body
PF: predicated region fallthrough
CT: control target
= control target key end

     0   :  { %10 = vsyncpa [#allocation3], 0  ;;  %s923_s0 = inlined_call_operand.vmem [shape: f32[2,4,256], index: 0, kind: input, shape index: {}]   ;;  %s924_s1 = inlined_call_operand.vmem [shape: f32[9,4,1], index: 1, kind: input, shape index: {}]   ;;  %s925_s2 = inlined_call_operand.vmem [shape: f32[1,4,1], index: 2, kind: input, shape index: {}]   ;;  %s926_s3 = inlined_call_operand.vmem [shape: f32[1,4,1], index: 3, kind: input, shape index: {}]   ;;  %s927_s4 = inlined_call_operand.vmem [shape: f32[4,1,256], index: 4, kind: input, shape index: {}]   ;;  %s928_s5 = inlined_call_operand.hbm [shape: f32[2,4,256], index: 5, kind: output, shape index: {}]  }
   0x1   :  { %12 = vsyncpa [#allocation3 + $0x1], 0  ;;  %s750_s18 = smov 0   ;;  %s752_s19 = smov 0  }
   0x2   :  { %s754_s20 = smov 0   ;;  %s756_s21 = smov 0  }
   0x3 LB: > { %s771_s22 = sadd.s32 4294967295, %s713_s21   ;;  %s569_s23 = sadd.s32 4294967294, %s713_s21   ;;  %s713_s21 = sphi %s756_s21, %s936_s21   ;;  %s709_s20 = sphi %s754_s20, %s935_s20   ;;  %s705_s19 = sphi %s752_s19, %s934_s19   ;;  %s701_s18 = sphi %s750_s18, %s933_s18  }
   0x4   : > { %s775_s24 = sadd.s32 1, %s713_s21   ;;  %s135_s25 = sadd.s32 1, %s709_s20 }
   0x5   : > { %s132_s26 = ssub.s32 %s713_s21, %s775_s24  ;;  %p145_p0 = scmp.ne.s32.totalorder %s709_s20, %s705_s19 }
   0x6   : > { %p133_p1 = scmp.eq.s32.totalorder %s132_s26, 0  ;;  %p146_p2 = scmp.eq.s32.totalorder %s771_s22, 1 }
   0x7   : > { %p151_p3 = scmp.ne.s32.totalorder %s705_s19, %s701_s18  ;;  %p152_p4 = scmp.eq.s32.totalorder %s569_s23, 1 }
   0x8   : > { %s786_s27 = scalar_select %p133_p1, %s709_s20, %s135_s25  }
   0x9   : > { %p788_p5 = por %p146_p2, %p145_p0  ;;  %p792_p6 = por %p152_p4, %p151_p3 }
   0xa   : > { %p572_p7 = scmp.ge.s32.totalorder %s713_s21, 1  ;;  %p190_p8 = scmp.lt.s32.totalorder %s713_s21, 3 }
   0xc   : > { %p191_p9 = pnand %p572_p7, %p190_p8 }
   0xd   : > { %p218_p10 = scmp.lt.s32.totalorder (!%p191_p9), %s771_s22, 1  ;;  %s716_s16 = smov (!%p191_p9), 1  }
   0xe   : > { %194 = sbr.rel (%p191_p9) target bundleno = 350 (0x15e), region = 40  ;;  %s717_s25 = smov (!%p191_p9), 127  }
   0xf   : > { %s718_s23 = smov (!%p191_p9), 16   ;;  %s719_s30 = smov (!%p191_p9), 112  }
  0x10   : > { %s215_s12 = sand.u32 (!%p191_p9), 1, %s705_s19   ;;  %s595_s14 = sshll.u32 (!%p191_p9), %s771_s22, 3 }
  0x11   : > { %s505_s17 = scalar_lea.hbm (!%p191_p9), %s928_s5, %s595_s14  ;;  %s494_s26 = scalar_lea.sflag (!%p191_p9), [#allocation3], %s215_s12 }
  0x13   : > { %v584_v0 = vld [vmem:[%s924_s1 + $0x18] sm:$0xf]  ;;  %v715_v1 = vmov 0   ;;  %v276_v2 = vld [vmem:[%s924_s1] sm:$0xf]  ;;  %s219_s9 = scalar_select %p218_p10, %s771_s22, 1  ;;  %v245_v21 = vlaneseq }
  0x14   : > { %642 = vset.pattern.permute.xlu1 %v715_v1  ;;  %640 = vset.pattern.permute.xlu2 %v715_v1  ;;  %v579_v4 = vld [vmem:[%s924_s1 + $0x4] sm:$0xf]  ;;  %v585_v7 = vld [vmem:[%s924_s1 + $0x1c] sm:$0xf]  ;;  %v581_v10 = vld [vmem:[%s924_s1 + $0xc] sm:$0xf] }
  0x15   : > { %351 = vperm.xlu1 %642, %v584_v0   ;;  %279 = vperm.xlu2 %640, %v276_v2   ;;  %s594_s10 = sshll.u32 %s219_s9, 3  ;;  %v580_v11 = vld [vmem:[%s924_s1 + $0x8] sm:$0xf]  ;;  %v582_v12 = vld [vmem:[%s924_s1 + $0x10] sm:$0xf]  ;;  %v847_v24 = vand.u32 127, %v245_v21 }
  0x16   : > { %641 = vset.pattern.permute.xlu0 %v715_v1  ;;  %s222_s13 = scalar_lea.vmem %s923_s0, %s594_s10  ;;  %v586_v13 = vld [vmem:[%s924_s1 + $0x20] sm:$0xf]  ;;  %v583_v14 = vld [vmem:[%s924_s1 + $0x14] sm:$0xf]  ;;  %s671_s9 = scalar_lea.hbm %s928_s5, 16 }
  0x17   : > { %v812_v3 = vld [vmem:[%s222_s13] sm:$0xff]  ;;  %vm247_vm2 = vcmp.lt.s32.totalorder %v847_v24, 1  ;;  %vm266_vm5 = vcmp.lt.s32.totalorder %v847_v24, 127  ;;  %vm387_vm10 = vcmp.lt.s32.totalorder %v847_v24, 16  ;;  %vm403_vm13 = vcmp.lt.s32.totalorder %v847_v24, 112  ;;  %s879_s13 = sshll.u32 %s215_s12, 3 }
  0x18   : > { %236 = vst [vmem:[#allocation1] ss:$2 sm:$0xff] %v812_v3  ;;  %v224_v19 = vld [vmem:[%s927_s4] sm:$0x3]  ;;  %v576_v26 = vld [vmem:[%s927_s4 + $0x2] sm:$0x3] }
  0x19   : > { %vm225_vm0 = vcmp.ne.f32.partialorder %v224_v19, 0.0  ;;  %vm228_vm1 = vcmp.ne.f32.partialorder %v576_v26, 0.0  ;;  %v425_v21 = vld [vmem:[%s926_s3] sm:$0xf]  ;;  %s217_s22 = scalar_lea.vmem [#allocation2], %s879_s13 }
  0x1a   : > { %v250_v25 = vsel %vm225_vm0, 1, %v715_v1  ;;  %v269_v31 = vsel %vm228_vm1, 1, %v715_v1  ;;  %vm433_vm0 = vcmask 1043456  }
  0x1b   : > { %v251_v27 = vperm.slane %v250_v25, 0  ;;  %v252_v28 = vperm.slane %v250_v25, 1  ;;  %v270_v35 = vperm.slane %v269_v31, 0  ;;  %v271_v36 = vperm.slane %v269_v31, 1 }
  0x1d   : > { %288 = vperm.xlu2 %640, %v579_v4   ;;  %vm253_vm3 = vcmp.eq.s32.totalorder %v251_v27, 1  ;;  %vm254_vm4 = vcmp.eq.s32.totalorder %v252_v28, 1  ;;  %vm272_vm6 = vcmp.eq.s32.totalorder %v270_v35, 1  ;;  %vm273_vm7 = vcmp.eq.s32.totalorder %v271_v36, 1 }
  0x1f   : > { %v237_v5 = vld.sshfl [vmem:[#allocation1] sm:$0xff pattern:$0x75316420]  ;;  %v238_v6 = vld.sshfl [vmem:[#allocation1 + $0x8] sm:$0xff pattern:$0x75316420] }
  0x20   : > { %241 = vrot.lane.b32.xlu0 %v237_v5, %s716_s16  ;;  %257 = vst [vmem:[#allocation1] ss:$2 sm:$0xff] %v812_v3 }
  0x25   : > { %360 = vperm.xlu2 %640, %v585_v7   ;;  %v415_v7 = vld [vmem:[%s925_s2] sm:$0xf] }
  0x27   : > { %v258_v8 = vld.sshfl [vmem:[#allocation1] sm:$0xff pattern:$0x75316420]  ;;  %v259_v9 = vld.sshfl [vmem:[#allocation1 + $0x8] sm:$0xff pattern:$0x75316420] }
  0x28   : > { %243 = vrot.lane.b32.xlu0 %v238_v6, %s716_s16  ;;  %262 = vrot.lane.b32.xlu1 %v258_v8, %s717_s25  ;;  %291 = vst [vmem:[#allocation1] ss:$2 sm:$0xff] %v812_v3 }
  0x2d   : > { %315 = vperm.xlu2 %640, %v581_v10  }
  0x2f   : > { %v292_v15 = vld.sshfl [vmem:[#allocation1] sm:$0xff pattern:$0x75316420]  ;;  %v293_v16 = vld.sshfl [vmem:[#allocation1 + $0x8] sm:$0xff pattern:$0x75316420] }
  0x30   : > { %304 = vperm.xlu0 %641, %v580_v11   ;;  %264 = vrot.lane.b32.xlu1 %v259_v9, %s717_s25  ;;  %327 = vst [vmem:[#allocation1] ss:$2 sm:$0xff] %v812_v3  ;;  %s509_s25 = sshll.u32 %s505_s17, 4  ;;  %s510_s25 = int_to_ptr.hbm [resolvable:$true] %s509_s25 }
  0x37   : > { %v839_v17 = vld.sshfl [vmem:[#allocation1] sm:$0xff pattern:$0x75316420]  ;;  %v841_v18 = vld.sshfl [vmem:[#allocation1 + $0x8] sm:$0xff pattern:$0x75316420] }
  0x38   : > { %324 = vperm.xlu0 %641, %v582_v12   ;;  %376 = vperm.xlu1 %642, %v586_v13   ;;  %363 = vst [vmem:[#allocation1] ss:$2 sm:$0xff] %v812_v3 }
  0x3f   : > { %v364_v54 = vld.sshfl [vmem:[#allocation1] sm:$0xff pattern:$0x75316420]  ;;  %v365_v58 = vld.sshfl [vmem:[#allocation1 + $0x8] sm:$0xff pattern:$0x75316420] }
  0x40   : > { %340 = vperm.xlu1 %642, %v583_v14  }
  0x6f   : > { %v280_v22 = vpop.permute.xlu2 %279 }
  0x77   : > { %v289_v34 = vpop.permute.xlu2 %288 }
  0x78   : > { %v296_v43 = vmul.f32 %v292_v15, %v289_v34  ;;  %v297_v44 = vmul.f32 %v293_v16, %v289_v34 }
  0x7f   : > { %v361_v53 = vpop.permute.xlu2 %360 }
  0x80   : > { %v368_v59 = vmul.f32 %v364_v54, %v361_v53  ;;  %v369_v62 = vmul.f32 %v365_v58, %v361_v53 }
  0x87   : > { %v352_v20 = vpop.permute.xlu1 %351  ;;  %v316_v11 = vpop.permute.xlu2 %315 }
  0x92   : > { %v242_v23 = vpop.permute.xlu0 %241 }
  0x9a   : > { %v244_v29 = vpop.permute.xlu0 %243  ;;  %v263_v30 = vpop.permute.xlu1 %262 }
  0x9b   : > { %v248_v32 = vsel %vm247_vm2, %v242_v23, %v244_v29  ;;  %v249_v33 = vsel %vm247_vm2, %v244_v29, %v242_v23  ;;  %v578_v23 = vld [vmem:[%s927_s4 + $0x6] sm:$0x3] }
  0x9c   : > { %v255_v37 = vsel %vm253_vm3, %v249_v33, 0.0  ;;  %v256_v38 = vsel %vm254_vm4, %v248_v32, 0.0  ;;  %vm234_vm9 = vcmp.ne.f32.partialorder %v578_v23, 0.0 }
  0x9d   : > { %v282_v39 = vmul.f32 %v280_v22, %v255_v37  ;;  %v283_v40 = vmul.f32 %v280_v22, %v256_v38  ;;  %v354_v55 = vmul.f32 %v352_v20, %v255_v37  ;;  %v355_v60 = vmul.f32 %v352_v20, %v256_v38 }
  0x9e   : > { %v318_v12 = vmul.f32 %v316_v11, %v255_v37  ;;  %v319_v13 = vmul.f32 %v316_v11, %v256_v38  ;;  %v406_v29 = vsel %vm234_vm9, 1, %v715_v1 }
  0x9f   : > { %v299_v51 = vadd.f32 %v297_v44, %v283_v40  ;;  %v298_v52 = vadd.f32 %v296_v43, %v282_v39  ;;  %v370_v63 = vadd.f32 %v368_v59, %v354_v55  ;;  %v371_v5 = vadd.f32 %v369_v62, %v355_v60 }
  0xa0   : > { %v407_v33 = vperm.slane %v406_v29, 0  ;;  %v408_v34 = vperm.slane %v406_v29, 1 }
  0xa2   : > { %v305_v41 = vpop.permute.xlu0 %304  ;;  %v265_v42 = vpop.permute.xlu1 %264  ;;  %vm409_vm14 = vcmp.eq.s32.totalorder %v407_v33, 1  ;;  %vm410_vm15 = vcmp.eq.s32.totalorder %v408_v34, 1 }
  0xa3   : > { %v267_v45 = vsel %vm266_vm5, %v263_v30, %v265_v42  ;;  %v268_v46 = vsel %vm266_vm5, %v265_v42, %v263_v30 }
  0xa4   : > { %v274_v47 = vsel %vm272_vm6, %v267_v45, 0.0  ;;  %v275_v48 = vsel %vm273_vm7, %v268_v46, 0.0 }
  0xa5   : > { %v307_v49 = vmul.f32 %v305_v41, %v274_v47  ;;  %v308_v50 = vmul.f32 %v305_v41, %v275_v48 }
  0xa7   : > { %v310_v56 = vadd.f32 %v308_v50, %v299_v51  ;;  %v309_v57 = vadd.f32 %v307_v49, %v298_v52 }
  0xa9   : > { %385 = vrot.lane.b32.xlu0 %v310_v56, %s718_s23  ;;  %383 = vrot.lane.b32.xlu2 %v309_v57, %s718_s23  ;;  %s507_s23 = sshll.u32 %s217_s22, 4  ;;  %s508_s23 = int_to_ptr.vmem [resolvable:$true] %s507_s23 }
  0xaa   : > { %v377_v61 = vpop.permute.xlu1 %376  ;;  %v325_v4 = vpop.permute.xlu0 %324 }
  0xab   : > { %v379_v0 = vmul.f32 %v377_v61, %v274_v47  ;;  %v380_v2 = vmul.f32 %v377_v61, %v275_v48  ;;  %v332_v8 = vmul.f32 %v839_v17, %v325_v4  ;;  %v333_v9 = vmul.f32 %v841_v18, %v325_v4  ;;  %v577_v18 = vld [vmem:[%s927_s4 + $0x4] sm:$0x3] }
  0xac   : > { %vm231_vm8 = vcmp.ne.f32.partialorder %v577_v18, 0.0 }
  0xad   : > { %v381_v6 = vadd.f32 %v379_v0, %v370_v63  ;;  %v382_v10 = vadd.f32 %v380_v2, %v371_v5  ;;  %v334_v15 = vadd.f32 %v332_v8, %v318_v12  ;;  %v335_v16 = vadd.f32 %v333_v9, %v319_v13 }
  0xae   : > { %v390_v25 = vsel %vm231_vm8, 1, %v715_v1 }
  0xaf   : > { %399 = vrot.lane.b32.xlu1 %v381_v6, %s719_s30  ;;  %v391_v27 = vperm.slane %v390_v25, 0  ;;  %v392_v28 = vperm.slane %v390_v25, 1 }
  0xb1   : > { %418 = vperm.xlu0 %641, %v415_v7   ;;  %401 = vrot.lane.b32.xlu2 %v382_v10, %s719_s30  ;;  %vm393_vm11 = vcmp.eq.s32.totalorder %v391_v27, 1  ;;  %vm394_vm12 = vcmp.eq.s32.totalorder %v392_v28, 1  ;;  %s665_s30 = sshra.s32 %s510_s25, 4  ;;  %s666_s30 = int_to_ptr.hbm [resolvable:$true] %s665_s30 }
  0xb2   : > { %v341_v14 = vpop.permute.xlu1 %340  ;;  %s667_s6 = scalar_lea.hbm %s666_s30, 8  ;;  %p672_p0 = scmp.lt.s32.totalorder %s666_s30, %s928_s5 }
  0xb3   : > { %v343_v19 = vmul.f32 %v341_v14, %v274_v47  ;;  %v344_v20 = vmul.f32 %v341_v14, %v275_v48  ;;  %p668_p11 = scmp.ne.s32.totalorder %s666_s30, %s667_s6  ;;  %p673_p1 = scmp.lt.s32.totalorder %s671_s9, %s667_s6 }
  0xb5   : > { %v345_v17 = vadd.f32 %v343_v19, %v334_v15  ;;  %v346_v22 = vadd.f32 %v344_v20, %v335_v16  ;;  %p669_p12 = pnand %p668_p11, %p788_p5  ;;  %p674_p2 = por %p673_p1, %p672_p0 }
  0xb7   : > { %428 = vperm.xlu1 %642, %v425_v21   ;;  %p670_p13 = pneg %p669_p12 }
  0xb9   : > { %p675_p3 = pnand %p674_p2, %p670_p13 }
 0x103   : > { %v384_v26 = vpop.permute.xlu2 %383 }
 0x10b   : > { %v402_v37 = vpop.permute.xlu2 %401 }
 0x11b   : > { %v386_v30 = vpop.permute.xlu0 %385 }
 0x11c   : > { %v388_v31 = vsel %vm387_vm10, %v384_v26, %v386_v30  ;;  %v389_v32 = vsel %vm387_vm10, %v386_v30, %v384_v26 }
 0x11d   : > { %v395_v35 = vsel %vm393_vm11, %v389_v32, 0.0  ;;  %v396_v36 = vsel %vm394_vm12, %v388_v31, 0.0 }
 0x11e   : > { %v397_v39 = vadd.f32 %v395_v35, %v345_v17  ;;  %v398_v40 = vadd.f32 %v396_v36, %v346_v22 }
 0x121   : > { %v400_v38 = vpop.permute.xlu1 %399 }
 0x122   : > { %v404_v41 = vsel %vm403_vm13, %v400_v38, %v402_v37  ;;  %v405_v42 = vsel %vm403_vm13, %v402_v37, %v400_v38 }
 0x123   : > { %v411_v1 = vsel %vm409_vm14, %v404_v41, 0.0  ;;  %v412_v43 = vsel %vm410_vm15, %v405_v42, 0.0  ;;  %v419_v46 = vpop.permute.xlu0 %418 }
 0x124   : > { %v413_v44 = vadd.f32 %v411_v1, %v397_v39  ;;  %v414_v45 = vadd.f32 %v412_v43, %v398_v40 }
 0x126   : > { %v421_v47 = vadd.f32 %v419_v46, %v413_v44  ;;  %v422_v48 = vadd.f32 %v419_v46, %v414_v45 }
 0x128   : > { %v423_v49 = vmax.f32 %v421_v47, 0.0  ;;  %v424_v50 = vmax.f32 %v422_v48, 0.0 }
 0x129   : > { %v429_v51 = vpop.permute.xlu1 %428 }
 0x12a   : > { %v431_v24 = vmul.f32 %v429_v51, %v423_v49  ;;  %v432_v52 = vmul.f32 %v429_v51, %v424_v50 }
 0x12c   : > { %v434_v53 = vsel %vm433_vm0, %v431_v24, 0.0  ;;  %v441_v54 = vsel %vm433_vm0, %v432_v52, 0.0 }
 0x12d   : > { %v435_v55 = vrot.slane %v434_v53, 4  ;;  %v442_v56 = vrot.slane %v441_v54, 4 }
 0x12f   : > { %v436_v57 = vadd.f32 %v435_v55, %v434_v53  ;;  %v443_v58 = vadd.f32 %v442_v56, %v441_v54 }
 0x131   : > { %v437_v59 = vrot.slane %v436_v57, 2  ;;  %v444_v60 = vrot.slane %v443_v58, 2 }
 0x133   : > { %v438_v61 = vadd.f32 %v437_v59, %v436_v57  ;;  %v445_v62 = vadd.f32 %v444_v60, %v443_v58 }
 0x135   : > { %v439_v63 = vrot.slane %v438_v61, 1  ;;  %v446_v0 = vrot.slane %v445_v62, 1 }
 0x137   : > { %v440_v2 = vadd.f32 %v439_v63, %v438_v61  ;;  %v447_v4 = vadd.f32 %v446_v0, %v445_v62 }
 0x139   : > { %v587_v5 = vmul.f32 -1.442695, %v440_v2  ;;  %v588_v6 = vmul.f32 -1.442695, %v447_v4 }
 0x13b   : > { %643 = vpow2.f32 %v587_v5 }
 0x13c   : > { %645 = vpow2.f32 %v588_v6 }
 0x141   : > { %v644_v7 = vpop.eup %643 }
 0x142   : > { %v646_v8 = vpop.eup %645  ;;  %v454_v9 = vadd.f32 1.0, %v644_v7 }
 0x143   : > { %v455_v10 = vadd.f32 1.0, %v646_v8 }
 0x144   : > { %647 = vrcp.f32 %v454_v9  ;;  %vm461_vm3 = vweird.f32 %v454_v9  ;;  %v467_v18 = vand.u32 2147483648, %v454_v9  ;;  %v465_v25 = vand.u32 2147483647, %v454_v9 }
 0x145   : > { %649 = vrcp.f32 %v455_v10  ;;  %v482_v20 = vand.u32 2147483648, %v455_v10  ;;  %v480_v17 = vand.u32 2147483647, %v455_v10  ;;  %vm476_vm5 = vweird.f32 %v455_v10 }
 0x146   : > { %v468_v30 = vor.u32 1.1754944e-38, %v467_v18  ;;  %vm466_vm8 = vcmp.eq.f32.partialorder %v465_v25, 8.507059e+37 }
 0x147   : > { %v483_v27 = vor.u32 1.1754944e-38, %v482_v20  ;;  %vm481_vm7 = vcmp.eq.f32.partialorder %v480_v17, 8.507059e+37 }
 0x14a   : > { %v648_v11 = vpop.eup %647 }
 0x14b   : > { %v650_v12 = vpop.eup %649  ;;  %v457_v13 = vmul.f32 %v648_v11, %v454_v9  ;;  %vm462_vm1 = vweird.f32 %v648_v11 }
 0x14c   : > { %v472_v14 = vmul.f32 %v650_v12, %v455_v10  ;;  %vm477_vm2 = vweird.f32 %v650_v12  ;;  %vm882_vm4 = vmor %vm461_vm3, %vm462_vm1 }
 0x14d   : > { %v458_v15 = vsub.f32 1.0, %v457_v13  ;;  %vm478_vm6 = vmor %vm476_vm5, %vm477_vm2 }
 0x14e   : > { %v473_v16 = vsub.f32 1.0, %v472_v14 }
 0x14f   : > { %v459_v19 = vmul.f32 %v648_v11, %v458_v15 }
 0x150   : > { %v474_v21 = vmul.f32 %v650_v12, %v473_v16 }
 0x151   : > { %v460_v22 = vadd.f32 %v648_v11, %v459_v19 }
 0x152   : > { %v475_v26 = vadd.f32 %v650_v12, %v474_v21 }
 0x153   : > { %v464_v28 = vsel %vm882_vm4, %v648_v11, %v460_v22 }
 0x154   : > { %v479_v29 = vsel %vm478_vm6, %v650_v12, %v475_v26  ;;  %v469_v33 = vsel %vm466_vm8, %v468_v30, %v464_v28 }
 0x155   : > { %v484_v31 = vsel %vm481_vm7, %v483_v27, %v479_v29 }
 0x156   : > { %v488_v32 = vrot.slane %v484_v31, 4 }
 0x158   : > { %v489_v34 = vsel %vm433_vm0, %v469_v33, %v488_v32 }
 0x159   : > { %v491_v35 = vmul.f32 %v489_v34, %v812_v3 }
 0x15b   : > { %492 = vst [vmem:[%s217_s22] sm:$0xff] %v491_v35 }
 0x15c   : > { %678 = shalt.err (!%p675_p3)
}
 0x15d   : > { %596 = dma.vmem_to_hbm [thread:$0]  (%p788_p5), %s508_s23, 128, %s510_s25, %s494_s26  }
 0x15e PF: > { %p602_p4 = scmp.ge.s32.totalorder %s713_s21, 2  ;;  %s521_s12 = sand.u32 1, %s701_s18  }
 0x15f   : > { %s522_s13 = scalar_lea.sflag [#allocation3], %s521_s12 }
 0x160   : > { %p599_p7 = pnand %p602_p4, %p792_p6 }
 0x162   : > { %p600_p8 = pneg %p599_p7 }
 0x164   : > { %696 = dma.done.wait (%p600_p8), %s522_s13, 128  }
 0x165   : > { %698 = vsyncadd (%p600_p8), %s522_s13, 4294967168  ;;  %p15_p9 = scmp.ge.s32.totalorder %s775_s24, 4   ;;  %s933_s18 = smov %s705_s19 }
 0x166   : > { %s934_s19 = smov %s709_s20  ;;  %s935_s20 = smov %s786_s27 }
 0x167   : > { %s936_s21 = smov %s775_s24  ;;  %17 = sbr.rel (!%p15_p9) target bundleno = 3 (0x3), region = 86 }
 0x16c   :  { %528 = vsyncpa [#allocation3], 1 }
 0x16d   :  { %530 = vsyncpa [#allocation3 + $0x1], 1 }

</bundles_post_ra>
